<compile_context>
chip_gen: v6e
topology: v6e:2x2x1
jax: 0.10.0
libtpu: 0.0.40
codegen_flags: <defaults>
</compile_context>

<pallas_src>
import functools

import jax
import jax.numpy as jnp
from jax.experimental import pallas as pl
from jax.experimental.pallas import tpu as pltpu

EPS = 1e-5                      # nn.LayerNorm default
_SUBLANE = 8                    # row-block granularity
_MAX_BLOCK_ROWS = 8192          # budget-driven cap (was 1024)
_W_RESIDENT_MAX_BYTES = 8 << 20 # W kept fully VMEM-resident below this


def _round_up(n, m):
    return ((n + m - 1) // m) * m


@functools.lru_cache(maxsize=1)
def _vmem_budgets():
    """(vmem_limit_bytes, per-step block budget), generation aware."""
    phys = 64 << 20  # conservative default: v7x has 64 MiB VMEM per TensorCore
    try:
        info = pltpu.get_tpu_info()
        for attr in ("vmem_capacity_bytes", "vmem_size_bytes", "vmem_bytes"):
            val = getattr(info, attr, None)
            if val:
                phys = int(val)
                break
    except Exception:
        pass
    # Leave headroom for Mosaic-internal scratch: 96 MiB on 128-MiB parts
    # (v5e/v6e), 48 MiB on v7x.
    vmem_limit = min((phys * 3) // 4, 96 << 20)
    block_budget = vmem_limit // 2   # live pipeline buffers per grid step
    return vmem_limit, block_budget


def _pick_block_rows(rows, bytes_per_row, fixed_bytes=0):
    """Largest row block whose live VMEM (double-buffered ins/outs + in-kernel
    f32 temporaries = `bytes_per_row` per row, after subtracting per-call
    fixed residents `fixed_bytes`) fits the generation-aware budget."""
    _, block_budget = _vmem_budgets()
    budget = max(block_budget - fixed_bytes, _SUBLANE * bytes_per_row)
    br = budget // max(1, bytes_per_row)
    br = max(_SUBLANE, min(_MAX_BLOCK_ROWS, br))
    br = (br // _SUBLANE) * _SUBLANE
    if br >= rows:
        # Whole problem fits one block. Split in two when there is enough work
        # so both of v7x's TensorCores get a tile (harmless on v5e/v6e).
        if rows >= 2 * _SUBLANE:
            half = _round_up((rows + 1) // 2, _SUBLANE)
            if half < rows:
                return half
        return rows
    return br


def _layernorm_f32(x_ref, g_ref, b_ref, inv_dim):
    """f32 LayerNorm of the current block; single-pass mean/variance."""
    x = x_ref[...].astype(jnp.float32)
    g = g_ref[...].astype(jnp.float32)
    b = b_ref[...].astype(jnp.float32)
    mean = jnp.sum(x, axis=-1, keepdims=True) * inv_dim
    ex2 = jnp.sum(x * x, axis=-1, keepdims=True) * inv_dim
    var = jnp.maximum(ex2 - mean * mean, 0.0)
    inv = jax.lax.rsqrt(var + EPS)
    return (x - mean) * inv * g + b


# ----------------------------------------------------------------------------
# Standalone LayerNorm kernel (generic wrapped fn).
# ----------------------------------------------------------------------------
def _layernorm_kernel(x_ref, g_ref, b_ref, o_ref, *, inv_dim):
    o_ref[...] = _layernorm_f32(x_ref, g_ref, b_ref, inv_dim).astype(o_ref.dtype)


@functools.partial(jax.jit, static_argnames=("block_rows",))
def layernorm_pallas(x, gamma, beta, *, block_rows=None):
    """LayerNorm over the last axis of x via a Pallas TPU kernel (no padding)."""
    orig_shape = x.shape
    dim = orig_shape[-1]
    rows = 1
    for s in orig_shape[:-1]:
        rows *= s

    x2d = x.reshape(rows, dim)
    g2d = gamma.reshape(1, dim)
    b2d = beta.reshape(1, dim)

    isz = jnp.dtype(x.dtype).itemsize
    if block_rows is None:
        # x + out blocks double-buffered, plus ~3 f32 block temporaries the
        # kernel materializes (x_f32, x*x, pre-cast result).
        bytes_per_row = 4 * dim * isz + 3 * dim * 4
        block_rows = _pick_block_rows(rows, bytes_per_row,
                                      fixed_bytes=4 * dim * isz)  # gamma/beta
    vmem_limit, _ = _vmem_budgets()

    out = pl.pallas_call(
        functools.partial(_layernorm_kernel, inv_dim=1.0 / dim),
        out_shape=jax.ShapeDtypeStruct((rows, dim), x.dtype),
        grid_spec=pltpu.PrefetchScalarGridSpec(
            num_scalar_prefetch=0,
            grid=(pl.cdiv(rows, block_rows),),   # ragged last block is fine: rows independent
            in_specs=[
                pl.BlockSpec((block_rows, dim), lambda i: (i, 0)),
                pl.BlockSpec((1, dim), lambda i: (0, 0)),  # VMEM-resident, no per-step DMA
                pl.BlockSpec((1, dim), lambda i: (0, 0)),
            ],
            out_specs=pl.BlockSpec((block_rows, dim), lambda i: (i, 0)),
        ),
        compiler_params=pltpu.CompilerParams(
            dimension_semantics=("parallel",),   # row grid splits across TCs on v7x
            vmem_limit_bytes=vmem_limit,
        ),
    )(x2d, g2d, b2d)
    return out.reshape(orig_shape)


# ----------------------------------------------------------------------------
# Fused LayerNorm + no-bias linear projection (PreNorm wrapping a projection).
# ----------------------------------------------------------------------------
def _ln_linear_wres_kernel(x_ref, g_ref, b_ref, w_ref, o_ref, *, inv_dim, mxu_dtype):
    # W is fully VMEM-resident (constant index_map); LN output feeds the MXU
    # directly as `mxu_dtype` and never touches HBM.
    y = _layernorm_f32(x_ref, g_ref, b_ref, inv_dim).astype(mxu_dtype)
    o_ref[...] = jnp.dot(
        y, w_ref[...], preferred_element_type=jnp.float32
    ).astype(o_ref.dtype)


def _ln_linear_tiled_kernel(x_ref, g_ref, b_ref, w_ref, o_ref, ln_ref, *, inv_dim):
    # Grid (row_tiles, n_tiles), N innermost: LayerNorm of a row block is
    # computed once (j == 0) into the VMEM scratch and reused for every N
    # tile, so the normalized activations never round-trip through HBM.
    # TODO(synk): overlap the j==0 LN bubble with the MXU via a 2-slot
    # revolving scratch if profiling shows it on the critical path.
    @pl.when(pl.program_id(1) == 0)
    def _():
        ln_ref[...] = _layernorm_f32(x_ref, g_ref, b_ref, inv_dim).astype(ln_ref.dtype)

    o_ref[...] = jnp.dot(
        ln_ref[...], w_ref[...], preferred_element_type=jnp.float32
    ).astype(o_ref.dtype)


@functools.partial(jax.jit, static_argnames=("block_rows", "mxu_dtype", "w_resident"))
def layernorm_linear_pallas(x, gamma, beta, w, *, block_rows=None,
                            mxu_dtype=None, w_resident=None):
    """Fused y = LayerNorm(x) @ w (LayerNorm over the last axis of x)."""
    orig_shape = x.shape
    dim = orig_shape[-1]
    out_dim = w.shape[-1]
    rows = 1
    for s in orig_shape[:-1]:
        rows *= s

    if mxu_dtype is None:
        # f32 x f32 is emulated at a fraction of MXU rate; bf16 runs at full
        # rate on v5e/v6e/v7x. LN arithmetic itself stays f32 on the VPU.
        mxu_dtype = jnp.bfloat16 if x.dtype == jnp.float32 else x.dtype
    mxu_isz = jnp.dtype(mxu_dtype).itemsize
    x_isz = jnp.dtype(x.dtype).itemsize

    x2d = x.reshape(rows, dim)
    g2d = gamma.reshape(1, dim)
    b2d = beta.reshape(1, dim)
    w_mx = w.astype(mxu_dtype)

    vmem_limit, _ = _vmem_budgets()
    w_bytes = dim * out_dim * mxu_isz
    if w_resident is None:
        w_resident = w_bytes <= _W_RESIDENT_MAX_BYTES
    inv_dim = 1.0 / dim

    if w_resident:
        # Single grid axis: W DMA'd once, never re-streamed per row tile.
        if block_rows is None:
            bytes_per_row = (2 * dim * x_isz        # x block, double-buffered
                             + 2 * out_dim * x_isz  # out block, double-buffered
                             + 3 * dim * 4          # f32 LN temporaries
                             + dim * mxu_isz        # normalized MXU operand
                             + out_dim * 4)         # f32 dot result
            block_rows = _pick_block_rows(
                rows, bytes_per_row, fixed_bytes=w_bytes + 4 * dim * x_isz)
        out = pl.pallas_call(
            functools.partial(_ln_linear_wres_kernel,
                              inv_dim=inv_dim, mxu_dtype=mxu_dtype),
            out_shape=jax.ShapeDtypeStruct((rows, out_dim), x.dtype),
            grid_spec=pltpu.PrefetchScalarGridSpec(
                num_scalar_prefetch=0,
                grid=(pl.cdiv(rows, block_rows),),
                in_specs=[
                    pl.BlockSpec((block_rows, dim), lambda i: (i, 0)),
                    pl.BlockSpec((1, dim), lambda i: (0, 0)),
                    pl.BlockSpec((1, dim), lambda i: (0, 0)),
                    pl.BlockSpec((dim, out_dim), lambda i: (0, 0)),  # W resident in VMEM
                ],
                out_specs=pl.BlockSpec((block_rows, out_dim), lambda i: (i, 0)),
            ),
            compiler_params=pltpu.CompilerParams(
                dimension_semantics=("parallel",),
                vmem_limit_bytes=vmem_limit,
            ),
        )(x2d, g2d, b2d, w_mx)
    else:
        # Large-W fallback: tile the output dim; LN result held in VMEM scratch.
        # TODO(synk): for very large `dim`, add a K grid axis + f32 accumulator.
        tn = 256 if out_dim % 256 == 0 else (128 if out_dim >= 128 else out_dim)
        if block_rows is None:
            bytes_per_row = (2 * dim * x_isz       # x block, double-buffered
                             + 2 * tn * x_isz      # out tile, double-buffered
                             + 3 * dim * 4         # f32 LN temporaries
                             + dim * mxu_isz       # LN scratch
                             + tn * 4)             # f32 dot result
            fixed = 2 * dim * tn * mxu_isz + 4 * dim * x_isz  # W tile (db) + gamma/beta
            block_rows = _pick_block_rows(rows, bytes_per_row, fixed_bytes=fixed)
        out = pl.pallas_call(
            functools.partial(_ln_linear_tiled_kernel, inv_dim=inv_dim),
            out_shape=jax.ShapeDtypeStruct((rows, out_dim), x.dtype),
            grid_spec=pltpu.PrefetchScalarGridSpec(
                num_scalar_prefetch=0,
                grid=(pl.cdiv(rows, block_rows), pl.cdiv(out_dim, tn)),
                in_specs=[
                    pl.BlockSpec((block_rows, dim), lambda i, j: (i, 0)),
                    pl.BlockSpec((1, dim), lambda i, j: (0, 0)),
                    pl.BlockSpec((1, dim), lambda i, j: (0, 0)),
                    pl.BlockSpec((dim, tn), lambda i, j: (0, j)),
                ],
                out_specs=pl.BlockSpec((block_rows, tn), lambda i, j: (i, j)),
                scratch_shapes=[pltpu.VMEM((block_rows, dim), mxu_dtype)],
            ),
            compiler_params=pltpu.CompilerParams(
                # N innermost + "arbitrary": consecutive j steps reuse the LN scratch.
                dimension_semantics=("parallel", "arbitrary"),
                vmem_limit_bytes=vmem_limit,
            ),
        )(x2d, g2d, b2d, w_mx)

    return out.reshape(orig_shape[:-1] + (out_dim,))


# ----------------------------------------------------------------------------
# PreNorm module
# ----------------------------------------------------------------------------
class LinearNoBias:
    """Minimal no-bias linear whose weight PreNormPallas can fuse with LN."""

    def __init__(self, weight):
        self.weight = weight  # (dim, out_dim)

    def __call__(self, t):
        return jnp.einsum("...d,de->...e", t, self.weight)


class PreNormPallas:
    """PreNorm: y = fn(LayerNorm(x)).

    LayerNorm always runs as a Pallas kernel; when fn is exactly a no-bias
    linear (LinearNoBias) with matching input dim, the matmul is fused into
    the same kernel so the normalized activations never round-trip through HBM.
    """

    def __init__(self, emb_dim, dim, fn):
        # nn.LayerNorm(dim) default init: weight=1, bias=0, eps=1e-5.
        self.dim = dim
        self.gamma = jnp.ones((dim,), dtype=jnp.float32)
        self.beta = jnp.zeros((dim,), dtype=jnp.float32)
        self.fn = fn
        # TODO(synk): `fn` may be an arbitrary submodule (e.g. full Attention);
        # only LayerNorm (+ an optional fused no-bias input projection) runs in Pallas.

    def __call__(self, x, **kwargs):
        fn = self.fn
        if (isinstance(fn, LinearNoBias) and not kwargs
                and getattr(fn.weight, "ndim", 0) == 2
                and fn.weight.shape[0] == self.dim):
            return layernorm_linear_pallas(x, self.gamma, self.beta, fn.weight)
        return fn(layernorm_pallas(x, self.gamma, self.beta), **kwargs)


if __name__ == "__main__":
    key = jax.random.PRNGKey(0)
    k1, k2, k3, k4, k5 = jax.random.split(key, 5)

    def ln_ref(x, gamma, beta):
        mean = jnp.mean(x, axis=-1, keepdims=True)
        var = jnp.mean((x - mean) ** 2, axis=-1, keepdims=True)
        return (x - mean) * jax.lax.rsqrt(var + EPS) * gamma + beta

    # 1) Standalone LN: ragged row count (21) and non-128 feature dim (40)
    #    exercise the no-padding path.
    b1, s1, d1 = 3, 7, 40
    x1 = jax.random.normal(k1, (b1, s1, d1), dtype=jnp.float32)
    g1 = 1.0 + 0.1 * jax.random.normal(k2, (d1,), dtype=jnp.float32)
    be1 = 0.1 * jax.random.normal(k3, (d1,), dtype=jnp.float32)
    out1 = jax.block_until_ready(layernorm_pallas(x1, g1, be1))
    assert out1.shape == x1.shape
    assert jnp.allclose(out1, ln_ref(x1, g1, be1), atol=1e-4, rtol=1e-4)

    # 2) PreNorm wrapping a no-bias linear -> fused LN+matmul, W VMEM-resident.
    b2, s2, dim, out_dim = 2, 8, 32, 64
    x2 = jax.random.normal(k4, (b2, s2, dim), dtype=jnp.float32)
    w2 = jax.random.normal(k5, (dim, out_dim), dtype=jnp.float32) * 0.02
    gamma = 1.0 + 0.1 * jax.random.normal(k2, (dim,), dtype=jnp.float32)
    beta = 0.1 * jax.random.normal(k3, (dim,), dtype=jnp.float32)
    pre_fused = PreNormPallas(emb_dim=16, dim=dim, fn=LinearNoBias(w2))
    pre_fused.gamma, pre_fused.beta = gamma, beta
    out2 = jax.block_until_ready(pre_fused(x2))
    ref2 = jnp.einsum("bsd,de->bse", ln_ref(x2, gamma, beta), w2,
                      precision=jax.lax.Precision.HIGHEST)
    assert out2.shape == (b2, s2, out_dim)
    # bf16 MXU operands -> looser tolerance than the f32 LN path.
    assert jnp.allclose(out2, ref2, atol=5e-3, rtol=5e-3)

    # 3) Force the N-tiled fused variant (large-W code path) at a small shape.
    w3 = jax.random.normal(k5, (dim, 384), dtype=jnp.float32) * 0.02
    out3 = jax.block_until_ready(
        layernorm_linear_pallas(x2, gamma, beta, w3, w_resident=False))
    ref3 = jnp.einsum("bsd,de->bse", ln_ref(x2, gamma, beta), w3,
                      precision=jax.lax.Precision.HIGHEST)
    assert out3.shape == (b2, s2, 384)
    assert jnp.allclose(out3, ref3, atol=5e-3, rtol=5e-3)

    # 4) PreNorm with a generic (non-linear) fn -> standalone LN kernel + fn.
    pre_gen = PreNormPallas(emb_dim=16, dim=dim, fn=lambda t: jax.nn.gelu(t))
    pre_gen.gamma, pre_gen.beta = gamma, beta
    out4 = jax.block_until_ready(pre_gen(x2))
    assert jnp.allclose(out4, jax.nn.gelu(ln_ref(x2, gamma, beta)),
                        atol=1e-4, rtol=1e-4)

    print("KERNEL_OK")
</pallas_src>

<mosaic_0001>
module attributes {stable_mosaic.version = 11 : i64} {
  func.func @_layernorm_kernel(%arg0: i32, %arg1: memref<16x40xf32, #tpu.memory_space<vmem>>, %arg2: memref<1x40xf32, #tpu.memory_space<vmem>>, %arg3: memref<1x40xf32, #tpu.memory_space<vmem>>, %arg4: memref<16x40xf32, #tpu.memory_space<vmem>>) attributes {dimension_semantics = [#tpu.dimension_semantics<parallel>], iteration_bounds = array<i64: 2>, scalar_prefetch = 0 : i64, scratch_operands = 0 : i64, tpu.core_type = #tpu.core_type<tc>, window_params = [{transform_indices = @transform_0, window_bounds = array<i64: 16, 40>}, {pipeline_mode = #tpu.pipeline_mode<synchronous>, transform_indices = @transform_1, window_bounds = array<i64: 1, 40>}, {pipeline_mode = #tpu.pipeline_mode<synchronous>, transform_indices = @transform_2, window_bounds = array<i64: 1, 40>}, {transform_indices = @transform_3, window_bounds = array<i64: 16, 40>}]} {
    %c0 = arith.constant 0 : index
    %c0_0 = arith.constant 0 : index
    %0 = vector.load %arg1[%c0, %c0_0] : memref<16x40xf32, #tpu.memory_space<vmem>>, vector<16x40xf32>
    %c0_1 = arith.constant 0 : index
    %c0_2 = arith.constant 0 : index
    %1 = vector.load %arg2[%c0_1, %c0_2] : memref<1x40xf32, #tpu.memory_space<vmem>>, vector<1x40xf32>
    %c0_3 = arith.constant 0 : index
    %c0_4 = arith.constant 0 : index
    %2 = vector.load %arg3[%c0_3, %c0_4] : memref<1x40xf32, #tpu.memory_space<vmem>>, vector<1x40xf32>
    %cst = arith.constant dense<0.000000e+00> : vector<16xf32>
    %3 = vector.multi_reduction <add>, %0, %cst [1] : vector<16x40xf32> to vector<16xf32>
    %4 = vector.shape_cast %3 : vector<16xf32> to vector<16x1xf32>
    %cst_5 = arith.constant 2.500000e-02 : f32
    %5 = vector.broadcast %cst_5 : f32 to vector<16x1xf32>
    %6 = arith.mulf %4, %5 : vector<16x1xf32>
    %7 = arith.mulf %0, %0 : vector<16x40xf32>
    %cst_6 = arith.constant dense<0.000000e+00> : vector<16xf32>
    %8 = vector.multi_reduction <add>, %7, %cst_6 [1] : vector<16x40xf32> to vector<16xf32>
    %9 = vector.shape_cast %8 : vector<16xf32> to vector<16x1xf32>
    %cst_7 = arith.constant 2.500000e-02 : f32
    %10 = vector.broadcast %cst_7 : f32 to vector<16x1xf32>
    %11 = arith.mulf %9, %10 : vector<16x1xf32>
    %12 = arith.mulf %6, %6 : vector<16x1xf32>
    %13 = arith.subf %11, %12 : vector<16x1xf32>
    %cst_8 = arith.constant 0.000000e+00 : f32
    %14 = vector.broadcast %cst_8 : f32 to vector<16x1xf32>
    %15 = arith.maximumf %13, %14 : vector<16x1xf32>
    %cst_9 = arith.constant 9.99999974E-6 : f32
    %16 = vector.broadcast %cst_9 : f32 to vector<16x1xf32>
    %17 = arith.addf %15, %16 : vector<16x1xf32>
    %18 = math.rsqrt %17 : vector<16x1xf32>
    %19 = vector.broadcast %6 : vector<16x1xf32> to vector<16x40xf32>
    %20 = arith.subf %0, %19 : vector<16x40xf32>
    %21 = vector.broadcast %18 : vector<16x1xf32> to vector<16x40xf32>
    %22 = arith.mulf %20, %21 : vector<16x40xf32>
    %23 = vector.broadcast %1 : vector<1x40xf32> to vector<16x40xf32>
    %24 = arith.mulf %22, %23 : vector<16x40xf32>
    %25 = vector.broadcast %2 : vector<1x40xf32> to vector<16x40xf32>
    %26 = arith.addf %24, %25 : vector<16x40xf32>
    %c0_10 = arith.constant 0 : index
    %c0_11 = arith.constant 0 : index
    %27 = vector.load %arg4[%c0_10, %c0_11] : memref<16x40xf32, #tpu.memory_space<vmem>>, vector<16x40xf32>
    tpu.vector_store %arg4[%c0_10, %c0_11], %26 {strides = array<i32>} : memref<16x40xf32, #tpu.memory_space<vmem>>, vector<16x40xf32>,
    return
  }
  func.func @transform_0(%arg0: i32) -> (i32, i32) {
    %c0_i32 = arith.constant 0 : i32
    %c0_i32_0 = arith.constant 0 : i32
    return %arg0, %c0_i32 : i32, i32
  }
  func.func @transform_1(%arg0: i32) -> (i32, i32) {
    %c0_i32 = arith.constant 0 : i32
    %c0_i32_0 = arith.constant 0 : i32
    %c0_i32_1 = arith.constant 0 : i32
    return %c0_i32, %c0_i32_0 : i32, i32
  }
  func.func @transform_2(%arg0: i32) -> (i32, i32) {
    %c0_i32 = arith.constant 0 : i32
    %c0_i32_0 = arith.constant 0 : i32
    %c0_i32_1 = arith.constant 0 : i32
    return %c0_i32, %c0_i32_0 : i32, i32
  }
  func.func @transform_3(%arg0: i32) -> (i32, i32) {
    %c0_i32 = arith.constant 0 : i32
    %c0_i32_0 = arith.constant 0 : i32
    return %arg0, %c0_i32 : i32, i32
  }
}

</mosaic_0001>

<bundles_post_ra>
// kernel: layernorm_pallas.1
= control target key start
LH: loop header
LB: loop body
LE: loop exit
PB: predicated region body
PF: predicated region fallthrough
CT: control target
= control target key end

     0   :  { %s696_s12 = smov 0   ;;  %s698_s13 = smov 0   ;;  %s791_s0 = inlined_call_operand.vmem [shape: f32[21,40], index: 0, kind: input, shape index: {}]   ;;  %s792_s1 = inlined_call_operand.vmem [shape: f32[1,40], index: 1, kind: input, shape index: {}]   ;;  %s793_s2 = inlined_call_operand.vmem [shape: f32[1,40], index: 2, kind: input, shape index: {}]   ;;  %s794_s3 = inlined_call_operand.vmem [shape: f32[21,40], index: 3, kind: output, shape index: {}]  }
   0x1   :  { %s700_s14 = smov 0  }
   0x2 LB: > { %s709_s15 = sadd.s32 4294967295, %s642_s14   ;;  %s711_s16 = sadd.s32 1, %s642_s14   ;;  %s642_s14 = sphi %s700_s14, %s798_s14   ;;  %s638_s13 = sphi %s698_s13, %s797_s13   ;;  %s634_s12 = sphi %s696_s12, %s796_s12  }
   0x3   : > { %s85_s17 = ssub.s32 %s642_s14, %s711_s16  ;;  %s88_s18 = sadd.s32 1, %s638_s13 }
   0x4   : > { %p86_p0 = scmp.eq.s32.totalorder %s85_s17, 0  ;;  %p98_p1 = scmp.ne.s32.totalorder %s638_s13, %s634_s12 }
   0x5   : > { %p99_p2 = scmp.eq.s32.totalorder %s709_s15, 1  ;;  %p470_p3 = scmp.ge.s32.totalorder %s642_s14, 1 }
   0x6   : > { %s719_s19 = scalar_select %p86_p0, %s638_s13, %s88_s18  }
   0x7   : > { %p721_p4 = por %p99_p2, %p98_p1  ;;  %p146_p5 = scmp.lt.s32.totalorder %s642_s14, 3 }
   0x9   : > { %p147_p6 = pnand %p470_p3, %p146_p5 }
   0xa   : > { %s726_s21 = sshll.u32 (!%p147_p6), %s709_s15, 1  ;;  %s170_s27 = sand.u32 (!%p147_p6), 1, %s634_s12  }
   0xb   : > { %150 = sbr.rel (%p147_p6) target bundleno = 234 (0xea), region = 32  ;;  %p178_p7 = scmp.lt.s32.totalorder (!%p147_p6), %s726_s21, 2 }
   0xc   : > { %s471_s30 = sshll.u32 (!%p147_p6), %s170_s27, 4 }
   0xd   : > { %s744_s6 = scalar_lea.vmem (!%p147_p6), [#allocation2], %s471_s30  }
  0x10   : > { %s179_s22 = scalar_select %p178_p7, %s726_s21, 2  ;;  %vm196_vm0 = vcmask 326656   ;;  %v474_v26 = vld [vmem:[%s792_s1] ss:$0 sm:$0xff] }
  0x11   : > { %v475_v28 = vld [vmem:[%s793_s2] ss:$0 sm:$0xff]  ;;  %s255_s7 = ssub.s32 (%p721_p4), 3, %s726_s21  ;;  %s493_s8 = sshll.u32 (%p721_p4), %s709_s15, 4 }
  0x12   : > { %s473_s23 = sshll.u32 %s179_s22, 3  ;;  %p256_p8 = scmp.lt.s32.totalorder (%p721_p4), %s255_s7, 2 }
  0x13   : > { %s181_s26 = scalar_lea.vmem %s791_s0, %s473_s23  ;;  %s757_s11 = scalar_lea.vmem (%p721_p4), %s794_s3, %s493_s8  }
  0x14   : > { %v192_v0 = vld [vmem:[%s181_s26] sm:$0xff]  ;;  %v193_v1 = vld [vmem:[%s181_s26 + $0x8] sm:$0xff] }
  0x15   : > { %v197_v2 = vsel %vm196_vm0, %v192_v0, 0.0  ;;  %v205_v3 = vmul.f32 %v192_v0, %v192_v0  ;;  %v206_v4 = vmul.f32 %v193_v1, %v193_v1  ;;  %v200_v6 = vsel %vm196_vm0, %v193_v1, 0.0 }
  0x16   : > { %198 = vadd.xlane.f32.xlu0 %v197_v2 }
  0x17   : > { %v207_v5 = vsel %vm196_vm0, %v205_v3, 0.0  ;;  %v210_v7 = vsel %vm196_vm0, %v206_v4, 0.0 }
  0x18   : > { %208 = vadd.xlane.f32.xlu1 %v207_v5 }
  0x1a   : > { %201 = vadd.xlane.f32.xlu0 %v200_v6 }
  0x1c   : > { %211 = vadd.xlane.f32.xlu1 %v210_v7 }
  0x9f   : > { %v199_v8 = vpop.xlane.xlu0 %198 }
  0xa0   : > { %v203_v9 = vmul.f32 0.025, %v199_v8 }
  0xa1   : > { %v209_v10 = vpop.xlane.xlu1 %208 }
  0xa2   : > { %v215_v11 = vmul.f32 %v203_v9, %v203_v9  ;;  %v213_v12 = vmul.f32 0.025, %v209_v10  ;;  %v225_v24 = vsub.f32 %v192_v0, %v203_v9 }
  0xa3   : > { %v202_v13 = vpop.xlane.xlu0 %201 }
  0xa4   : > { %v217_v14 = vsub.f32 %v213_v12, %v215_v11  ;;  %v204_v15 = vmul.f32 0.025, %v202_v13 }
  0xa5   : > { %v212_v16 = vpop.xlane.xlu1 %211 }
  0xa6   : > { %v219_v17 = vmax.f32 %v217_v14, 0.0  ;;  %v216_v18 = vmul.f32 %v204_v15, %v204_v15  ;;  %v214_v19 = vmul.f32 0.025, %v212_v16  ;;  %v226_v30 = vsub.f32 %v193_v1, %v204_v15 }
  0xa8   : > { %v221_v20 = vadd.f32 1e-05, %v219_v17  ;;  %v218_v21 = vsub.f32 %v214_v19, %v216_v18 }
  0xaa   : > { %584 = vrsqrt.f32 %v221_v20  ;;  %v220_v22 = vmax.f32 %v218_v21, 0.0 }
  0xac   : > { %v222_v23 = vadd.f32 1e-05, %v220_v22 }
  0xae   : > { %586 = vrsqrt.f32 %v222_v23 }
  0xb7   : > { %v585_v25 = vpop.eup %584 }
  0xb8   : > { %v227_v27 = vmul.f32 %v585_v25, %v225_v24 }
  0xba   : > { %v235_v29 = vmul.f32 %v474_v26, %v227_v27 }
  0xbb   : > { %v587_v31 = vpop.eup %586 }
  0xbc   : > { %v243_v32 = vadd.f32 %v475_v28, %v235_v29  ;;  %v228_v33 = vmul.f32 %v587_v31, %v226_v30 }
  0xbe   : > { %245 = vst.msk [vmem:[%s744_s6] sm:$0xff] %vm196_vm0, %v243_v32  ;;  %v236_v34 = vmul.f32 %v474_v26, %v228_v33  ;;  %253 = sbr.rel (!%p721_p4) target bundleno = 234 (0xea), region = 36 }
  0xc0   : > { %v244_v35 = vadd.f32 %v475_v28, %v236_v34 }
  0xc2   : > { %246 = vst.msk [vmem:[%s744_s6 + $0x8] sm:$0xff] %vm196_vm0, %v244_v35 }
  0xc3   : > { %s800_s7 = smov (!%p256_p8, %s255_s7), 2 }
  0xc4   : > { %s478_s12 = sshll.u32 %s800_s7, 7 }
  0xc5   : > { %p481_p9 = scmp.eq.s32.totalorder %s478_s12, 0 }
  0xc6   : > { %s763_s14 = sshrl.u32 (!%p481_p9), %s800_s7, 1 }
  0xc7   : > { %264 = sbr.rel (%p481_p9) target bundleno = 234 (0xea), region = 40  ;;  %p482_p10 = scmp.le.s32.totalorder (!%p481_p9), %s763_s14, 0 }
  0xcc   : > { %423 = sbr.rel (%p482_p10) target bundleno = 217 (0xd9), region = 116  ;;  %s644_s15 = smov (!%p482_p10), %s757_s11  }
  0xcd   : > { %s648_s17 = smov (!%p482_p10), %s744_s6   ;;  %s652_s18 = smov (!%p482_p10), 0  }
  0xce   : > { %s656_s20 = smov (!%p482_p10), 0  }
  0xd1 LB: >> { %v329_v36 = vld [vmem:[%s650_s17] sm:$0xff]  ;;  %v331_v37 = vld [vmem:[%s650_s17 + $0x8] sm:$0xff]  ;;  %s333_s21 = sadd.s32 1, %s654_s18  ;;  %s323_s20 = sadd.s32 1, %s658_s20   ;;  %s658_s20 = sphi %s656_s20, %s323_s20   ;;  %s654_s18 = sphi %s652_s18, %s653_s18   ;;  %s650_s17 = sphi %s648_s17, %s338_s17   ;;  %s646_s15 = sphi %s644_s15, %s339_s15  }
  0xd2   : >> { %330 = vst [vmem:[%s646_s15] sm:$0xff] %v329_v36  ;;  %332 = vst [vmem:[%s646_s15 + $0x8] sm:$0xff] %v331_v37  ;;  %p334_p11 = scmp.ge.s32.totalorder %s333_s21, %s763_s14  ;;  %p322_p12 = scmp.ge.s32.totalorder %s323_s20, %s763_s14 }
  0xd4   : >> { %s802_s21 = smov (%p334_p11, %s333_s21), 0  ;;  %325 = sbr.rel (!%p322_p12) target bundleno = 209 (0xd1), region = 122 }
  0xd5   : >> { %s483_s22 = sshll.u32 %s802_s21, 4  ;;  %s653_s18 = smov %s802_s21  }
  0xd6   : >> { %s338_s17 = scalar_lea.vmem %s744_s6, %s483_s22 [#allocation2]   ;;  %s339_s15 = scalar_lea.vmem %s757_s11, %s483_s22  }
  0xd9 PF: > { %s773_s23 = sand.u32 1, %s800_s7   ;;  %s494_s24 = sshll.u32 %s763_s14, 4 }
  0xda   : > { %s344_s25 = scalar_lea.vmem %s744_s6, %s494_s24 [#allocation2]   ;;  %s346_s26 = scalar_lea.vmem %s757_s11, %s494_s24  }
  0xdb   : > { %p488_p13 = scmp.le.s32.totalorder %s773_s23, 0 }
  0xdc   : > { %s660_s27 = smov (!%p488_p13), %s346_s26   ;;  %s664_s28 = smov (!%p488_p13), %s344_s25  }
  0xdd   : > { %437 = sbr.rel (%p488_p13) target bundleno = 234 (0xea), region = 127  ;;  %s668_s29 = smov (!%p488_p13), 0  }
  0xde   : > { %s672_s30 = smov (!%p488_p13), 0  }
  0xe2 LB: >> { %v356_v38 = vld [vmem:[%s666_s28] sm:$0xff]  ;;  %s358_s4 = sadd.s32 1, %s670_s29  ;;  %s350_s30 = sadd.s32 1, %s674_s30   ;;  %s674_s30 = sphi %s672_s30, %s350_s30   ;;  %s670_s29 = sphi %s668_s29, %s669_s29   ;;  %s666_s28 = sphi %s664_s28, %s363_s28   ;;  %s662_s27 = sphi %s660_s27, %s364_s27  }
  0xe3   : >> { %357 = vst [vmem:[%s662_s27] sm:$0xff] %v356_v38  ;;  %p359_p0 = scmp.ge.s32.totalorder %s358_s4, %s773_s23  ;;  %p349_p1 = scmp.ge.s32.totalorder %s350_s30, %s773_s23 }
  0xe5   : >> { %s804_s4 = smov (%p359_p0, %s358_s4), 0  ;;  %352 = sbr.rel (!%p349_p1) target bundleno = 226 (0xe2), region = 133 }
  0xe6   : >> { %s489_s5 = sshll.u32 %s804_s4, 3  ;;  %s669_s29 = smov %s804_s4  }
  0xe7   : >> { %s363_s28 = scalar_lea.vmem %s344_s25, %s489_s5 [#allocation2]   ;;  %s364_s27 = scalar_lea.vmem %s346_s26, %s489_s5  }
  0xea PF: > { %p10_p2 = scmp.ge.s32.totalorder %s711_s16, 4   ;;  %s796_s12 = smov %s638_s13 }
  0xeb   : > { %s797_s13 = smov %s719_s19  ;;  %s798_s14 = smov %s711_s16 }
  0xec   :  { %12 = sbr.rel (!%p10_p2) target bundleno = 2 (0x2), region = 144 }

</bundles_post_ra>
